<compile_context>
chip_gen: v7x
topology: tpu7x:2x2x1
jax: 0.10.0
libtpu: 0.0.40
codegen_flags: <defaults>
</compile_context>

<pallas_src>
import functools

import jax
import jax.numpy as jnp
from jax import lax
from jax.experimental import pallas as pl
from jax.experimental.pallas import tpu as pltpu


def _round_up(v, m):
    return ((v + m - 1) // m) * m


# ---------------------------------------------------------------------------
# Kernel
# ---------------------------------------------------------------------------
def _sentence_maxpool_kernel(x_ref, w_ref, b_ref, o_ref, *, relu, s_valid):
    # x_ref: (bt, S_pad, D_in)   w_ref: (D_in, tn)  (pre-transposed, MXU-ready)
    # b_ref: (1, tn)             o_ref: (bt, tn)
    bt, s_pad, d_in = x_ref.shape
    # Merge (b, s) into one large MXU M-dim; layout-free because S_pad % 8 == 0.
    x2d = x_ref[...].reshape(bt * s_pad, d_in)
    h = jnp.dot(x2d, w_ref[...], preferred_element_type=jnp.float32)   # (bt*S_pad, tn)
    h = h.reshape(bt, s_pad, h.shape[-1])
    if s_valid != s_pad:
        # Padded sequence rows must never win the max (for either relu path).
        s_idx = lax.broadcasted_iota(jnp.int32, h.shape, 1)
        h = jnp.where(s_idx < s_valid, h, -jnp.inf)
    m = jnp.max(h, axis=1) + b_ref[...]           # bias folded after the sequence max
    if relu:
        m = jnp.maximum(m, 0.0)
    o_ref[...] = m.astype(o_ref.dtype)


# ---------------------------------------------------------------------------
# One-time (per model) parameter prep -- hoisted off the per-call path.
# ---------------------------------------------------------------------------
_SINGLE_TILE_W_BYTES = 8 << 20   # weight <= 8 MiB: keep it as one resident N tile


def prepare_params(weight, bias):
    """Pad D_out to a lane-dense multiple and pre-transpose W to (D_in, D_out_pad).

    weight: (D_out, D_in) nn.Linear layout; bias: (D_out,).
    Returns (w_t, bias_2d, tn) where tn is the output (N) tile width.
    """
    d_out, d_in = weight.shape
    itemsize = jnp.dtype(weight.dtype).itemsize
    d_out_128 = _round_up(d_out, 128)
    if d_in * d_out_128 * itemsize <= _SINGLE_TILE_W_BYTES:
        tn = d_out_128                     # single resident weight tile
    else:
        tn = 512                           # multiple of 256 (v6e/v7x MXU) and 128 (v5e)
    d_out_pad = _round_up(d_out, tn)
    if d_out_pad != d_out:
        weight = jnp.pad(weight, ((0, d_out_pad - d_out), (0, 0)))
        bias = jnp.pad(bias, (0, d_out_pad - d_out))
    w_t = jnp.transpose(weight)            # (D_in, D_out_pad): MXU consumes directly
    return w_t, bias.reshape(1, d_out_pad), tn


# ---------------------------------------------------------------------------
# Wrapper
# ---------------------------------------------------------------------------
def sentence_maxpool(x, w_t, bias2d, tn, out_dim, relu=True):
    """x: (B, S, D_in); (w_t, bias2d, tn) from prepare_params; returns (B, out_dim)."""
    B, S, D_in = x.shape
    assert w_t.shape[0] == D_in
    D_out_pad = w_t.shape[1]
    assert D_out_pad % tn == 0
    itemsize = jnp.dtype(x.dtype).itemsize

    # S must be sublane-aligned for the free (bt,S,D_in)<->(bt*S,D_in) reshape.
    # Rarely-needed pad rows are masked to -inf inside the kernel before the max.
    S_pad = _round_up(S, 8)
    if S_pad != S:
        x = jnp.pad(x, ((0, 0), (0, S_pad - S), (0, 0)))

    # Generation-gated VMEM / tile budgets (v5e/v6e: 128 MiB VMEM, v7x: 64 MiB).
    try:
        vmem_cap = pltpu.get_tpu_info().vmem_capacity_bytes
    except Exception:
        vmem_cap = 64 << 20                       # conservative (v7x-safe) fallback
    if vmem_cap >= (128 << 20):
        vmem_limit, x_tile_budget, target_m = 100 << 20, 8 << 20, 1024
    else:
        vmem_limit, x_tile_budget, target_m = 48 << 20, 4 << 20, 256

    # Batch tile: fill the MXU M-dim, clamp to the byte budget AFTER the sublane
    # round-up, and keep >= 2 grid steps so v7x's two TensorCores both get work.
    if B <= 8:
        bt = B                                    # full batch dim -> no ragged block
    else:
        bt = _round_up(pl.cdiv(target_m, S_pad), 8)
        row_bytes = S_pad * D_in * itemsize
        bt = min(bt, max(8, (x_tile_budget // row_bytes) // 8 * 8))
        bt = min(bt, max(8, _round_up(pl.cdiv(B, 2), 8)))   # >= 2 grid steps
    grid_b = pl.cdiv(B, bt)                       # ragged last block handled by Pallas
    grid_n = D_out_pad // tn

    kernel = functools.partial(_sentence_maxpool_kernel, relu=relu, s_valid=S)

    out = pl.pallas_call(
        kernel,
        out_shape=jax.ShapeDtypeStruct((B, D_out_pad), x.dtype),
        grid_spec=pltpu.PrefetchScalarGridSpec(
            num_scalar_prefetch=0,
            grid=(grid_b, grid_n),                # N innermost: x tile DMA'd once per b
            in_specs=[
                pl.BlockSpec((bt, S_pad, D_in), lambda b, j: (b, 0, 0)),
                # TODO(synk): single-buffer the resident weight/bias (pl.Buffered(1))
                # when grid_n == 1 to halve their VMEM footprint on v7x.
                pl.BlockSpec((D_in, tn), lambda b, j: (0, j)),
                pl.BlockSpec((1, tn), lambda b, j: (0, j)),
            ],
            out_specs=pl.BlockSpec((bt, tn), lambda b, j: (b, j)),
        ),
        compiler_params=pltpu.CompilerParams(
            dimension_semantics=("parallel", "parallel"),
            vmem_limit_bytes=vmem_limit,
        ),
    )(x, w_t, bias2d)

    return out[:, :out_dim]


# ---------------------------------------------------------------------------
# Reference + demo
# ---------------------------------------------------------------------------
def reference(x, weight, bias, relu=True):
    h = jnp.einsum("bsd,od->bso", x, weight) + bias
    if relu:
        h = jnp.maximum(h, 0.0)
    return jnp.max(h, axis=1)


if __name__ == "__main__":
    # Shapes consistent with the forward: (batch=2, seq=8, word_dim=32) -> (2, out_dim=48)
    B, S, D_in, D_out = 2, 8, 32, 48
    key = jax.random.PRNGKey(0)
    kx, kw, kb = jax.random.split(key, 3)

    x = jax.random.normal(kx, (B, S, D_in), dtype=jnp.float32)
    # PyTorch nn.Linear layout (D_out, D_in), uniform +-1/sqrt(D_in) init.
    bound = 1.0 / (D_in ** 0.5)
    weight = jax.random.uniform(kw, (D_out, D_in), minval=-bound, maxval=bound, dtype=jnp.float32)
    bias = jax.random.uniform(kb, (D_out,), minval=-bound, maxval=bound, dtype=jnp.float32)

    # One-time (per model) prep: lane-dense pad + transpose, hoisted off the call path.
    w_t, b2d, tn = prepare_params(weight, bias)

    out = sentence_maxpool(x, w_t, b2d, tn, D_out, relu=True)
    out = jax.block_until_ready(out)

    ref = reference(x, weight, bias, relu=True)
    assert out.shape == (B, D_out)
    assert jnp.allclose(out, ref, atol=1e-5, rtol=1e-5), "mismatch vs reference"

    print("KERNEL_OK")
</pallas_src>

<mosaic_0001>
module attributes {stable_mosaic.version = 11 : i64} {
  func.func @_sentence_maxpool_kernel(%arg0: i32, %arg1: i32, %arg2: memref<2x8x32xf32, #tpu.memory_space<vmem>>, %arg3: memref<32x128xf32, #tpu.memory_space<vmem>>, %arg4: memref<1x128xf32, #tpu.memory_space<vmem>>, %arg5: memref<2x128xf32, #tpu.memory_space<vmem>>) attributes {dimension_semantics = [#tpu.dimension_semantics<parallel>, #tpu.dimension_semantics<parallel>], iteration_bounds = array<i64: 1, 1>, scalar_prefetch = 0 : i64, scratch_operands = 0 : i64, tpu.core_type = #tpu.core_type<tc>, window_params = [{transform_indices = @transform_0, window_bounds = array<i64: 2, 8, 32>}, {transform_indices = @transform_1, window_bounds = array<i64: 32, 128>}, {transform_indices = @transform_2, window_bounds = array<i64: 1, 128>}, {transform_indices = @transform_3, window_bounds = array<i64: 2, 128>}]} {
    %c0 = arith.constant 0 : index
    %c0_0 = arith.constant 0 : index
    %c0_1 = arith.constant 0 : index
    %0 = vector.load %arg2[%c0, %c0_0, %c0_1] : memref<2x8x32xf32, #tpu.memory_space<vmem>>, vector<2x8x32xf32>
    %1 = vector.shape_cast %0 : vector<2x8x32xf32> to vector<16x32xf32>
    %c0_2 = arith.constant 0 : index
    %c0_3 = arith.constant 0 : index
    %2 = vector.load %arg3[%c0_2, %c0_3] : memref<32x128xf32, #tpu.memory_space<vmem>>, vector<32x128xf32>
    %cst = arith.constant dense<0.000000e+00> : vector<16x128xf32>
    %3 = tpu.matmul %1, %2, %cst {dimension_numbers = #tpu.dot_dimension_numbers<[1], [0], [0], [1], [0, 0, 1, 1], [], []>} : vector<16x32xf32>, vector<32x128xf32>, vector<16x128xf32> -> vector<16x128xf32>
    %4 = vector.shape_cast %3 : vector<16x128xf32> to vector<2x8x128xf32>
    %cst_4 = arith.constant dense<0xFF800000> : vector<2x128xf32>
    %5 = vector.multi_reduction <maximumf>, %4, %cst_4 [1] : vector<2x8x128xf32> to vector<2x128xf32>
    %c0_5 = arith.constant 0 : index
    %c0_6 = arith.constant 0 : index
    %6 = vector.load %arg4[%c0_5, %c0_6] : memref<1x128xf32, #tpu.memory_space<vmem>>, vector<1x128xf32>
    %7 = vector.broadcast %6 : vector<1x128xf32> to vector<2x128xf32>
    %8 = arith.addf %5, %7 : vector<2x128xf32>
    %cst_7 = arith.constant 0.000000e+00 : f32
    %9 = vector.broadcast %cst_7 : f32 to vector<2x128xf32>
    %10 = arith.maximumf %8, %9 : vector<2x128xf32>
    %c0_8 = arith.constant 0 : index
    %c0_9 = arith.constant 0 : index
    %11 = vector.load %arg5[%c0_8, %c0_9] : memref<2x128xf32, #tpu.memory_space<vmem>>, vector<2x128xf32>
    tpu.vector_store %arg5[%c0_8, %c0_9], %10 {strides = array<i32>} : memref<2x128xf32, #tpu.memory_space<vmem>>, vector<2x128xf32>,
    return
  }
  func.func @transform_0(%arg0: i32, %arg1: i32) -> (i32, i32, i32) {
    %c0_i32 = arith.constant 0 : i32
    %c0_i32_0 = arith.constant 0 : i32
    %c0_i32_1 = arith.constant 0 : i32
    return %arg0, %c0_i32, %c0_i32_0 : i32, i32, i32
  }
  func.func @transform_1(%arg0: i32, %arg1: i32) -> (i32, i32) {
    %c0_i32 = arith.constant 0 : i32
    %c0_i32_0 = arith.constant 0 : i32
    return %c0_i32, %arg1 : i32, i32
  }
  func.func @transform_2(%arg0: i32, %arg1: i32) -> (i32, i32) {
    %c0_i32 = arith.constant 0 : i32
    %c0_i32_0 = arith.constant 0 : i32
    return %c0_i32, %arg1 : i32, i32
  }
  func.func @transform_3(%arg0: i32, %arg1: i32) -> (i32, i32) {
    %c0_i32 = arith.constant 0 : i32
    return %arg0, %arg1 : i32, i32
  }
}

</mosaic_0001>

<bundles_post_ra>
// kernel: tpu_custom_call.1
= control target key start
LH: loop header
LB: loop body
LE: loop exit
PB: predicated region body
PF: predicated region fallthrough
CT: control target
= control target key end

     0   :  { %8 = vsyncpa [#allocation3], 0  ;;  %s346_s0 = inlined_call_operand.hbm [shape: f32[2,8,32], index: 0, kind: input, shape index: {}]   ;;  %s347_s1 = inlined_call_operand.hbm [shape: f32[32,128], index: 1, kind: input, shape index: {}]   ;;  %s348_s2 = inlined_call_operand.vmem [shape: f32[1,128], index: 2, kind: input, shape index: {}]   ;;  %s349_s3 = inlined_call_operand.hbm [shape: f32[2,128], index: 3, kind: output, shape index: {}]  }
   0x1   :  { %9 = vsyncpa [#allocation6], 0 }
   0x2   :  { %10 = vsyncpa [#allocation4], 0  ;;  %s282_s12 = smov [#allocation2]   ;;  %s210_s16 = scalar_lea.hbm %s346_s0, 256 }
   0x3   :  { %s16_s13 = sshll.u32 %s282_s12, 4  ;;  %p211_p0 = scmp.ne.s32.totalorder %s346_s0, %s210_s16  ;;  %s17_s13 = int_to_ptr.vmem [resolvable:$true] %s16_s13 }
   0x4   :  { %p214_p1 = scmp.lt.u32.totalorder %s210_s16, %s346_s0 }
   0x6   :  { %p216_p2 = pnand %p214_p1, %p211_p0 }
   0x8   :  { %219 = shalt.err (!%p216_p2)
}
   0x9   :  { %s220_s21 = scalar_lea.vmem %s17_s13, 256  ;;  %p225_p4 = scmp.lt.s32.totalorder %s17_s13, %s17_s13 }
   0xa   :  { %p221_p3 = scmp.ne.s32.totalorder %s17_s13, %s220_s21  ;;  %p226_p5 = scmp.lt.s32.totalorder %s220_s21, %s220_s21 }
   0xc   :  { %p227_p6 = por %p226_p5, %p225_p4 }
   0xe   :  { %p228_p7 = pnand %p227_p6, %p221_p3 }
  0x10   :  { %231 = shalt.err (!%p228_p7)
}
  0x11   :  { %s283_s22 = smov 128   ;;  %s284_s23 = smov 8  }
  0x12   :  { %22 = dma.hbm_to_vmem [thread:$0]  %s346_s0, 256, %s17_s13, [#allocation3], %s283_s22, %s283_s22, %s284_s23  }
  0x13   :  { %s285_s26 = smov [#allocation5]   ;;  %s232_s30 = scalar_lea.hbm %s347_s1, 512 }
  0x14   :  { %s28_s27 = sshll.u32 %s285_s26, 4  ;;  %p233_p8 = scmp.ne.s32.totalorder %s347_s1, %s232_s30  ;;  %s29_s27 = int_to_ptr.vmem [resolvable:$true] %s28_s27 }
  0x15   :  { %p236_p9 = scmp.lt.u32.totalorder %s232_s30, %s347_s1 }
  0x17   :  { %p238_p10 = pnand %p236_p9, %p233_p8 }
  0x19   :  { %241 = shalt.err (!%p238_p10)
}
  0x1a   :  { %s242_s8 = scalar_lea.vmem %s29_s27, 512  ;;  %p247_p12 = scmp.lt.s32.totalorder %s29_s27, %s29_s27 }
  0x1b   :  { %p243_p11 = scmp.ne.s32.totalorder %s29_s27, %s242_s8  ;;  %p248_p13 = scmp.lt.s32.totalorder %s242_s8, %s242_s8 }
  0x1d   :  { %p249_p0 = por %p248_p13, %p247_p12 }
  0x1f   :  { %p250_p1 = pnand %p249_p0, %p243_p11 }
  0x21   :  { %253 = shalt.err (!%p250_p1)
}
  0x22   :  { %34 = dma.hbm_to_vmem [thread:$0]  %s347_s1, 512, %s29_s27, [#allocation6], %s283_s22, %s283_s22, %s284_s23  }
  0x23   :  { %276 = dma.done.wait [#allocation3], 256  }
  0x24   :  { %277 = vsyncadd [#allocation3], 4294967040 }
  0x25   :  { %278 = dma.done.wait [#allocation6], 512  }
  0x26   :  { %279 = vsyncadd [#allocation6], 4294966784  ;;  %vm49_vm0 = vcmask 261120   ;;  %v45_v0 = vld [vmem:[#allocation5] sm:$0xff]  ;;  %v46_v1 = vld [vmem:[#allocation5 + $0x8] sm:$0xff]  ;;  %s286_s11 = smov [#allocation7]  }
  0x27   :  { %v47_v2 = vld [vmem:[#allocation5 + $0x10] sm:$0xff]  ;;  %v197_v3 = vpack.c.bf16 %v46_v1, %v45_v0  ;;  %v48_v4 = vld [vmem:[#allocation5 + $0x18] sm:$0xff]  ;;  %s167_s12 = sshll.u32 %s286_s11, 4  ;;  %vm157_vm1 = vcmask 1041409   ;;  %s168_s12 = int_to_ptr.vmem [resolvable:$true] %s167_s12 }
  0x28   :  { %v43_v5 = vld [vmem:[#allocation2] sm:$0xff]  ;;  %v201_v6 = vpack.c.bf16 %v48_v4, %v47_v2  ;;  %v44_v7 = vld [vmem:[#allocation2 + $0x8] sm:$0xff]  ;;  %s254_s13 = scalar_lea.vmem %s168_s12, 32  ;;  %p259_p3 = scmp.lt.s32.totalorder %s168_s12, %s168_s12 }
  0x29   :  { %194 = vmatprep.mubr.msk.f32.mxu0 %vm49_vm0, %v43_v5  ;;  %198 = vmatprep.subr.bf16.mxu0 %v197_v3  ;;  %v179_v20 = vld [vmem:[%s348_s2] ss:$0 sm:$0xff]  ;;  %p255_p2 = scmp.ne.s32.totalorder %s168_s12, %s254_s13  ;;  %p260_p4 = scmp.lt.s32.totalorder %s254_s13, %s254_s13 }
  0x2a   :  { %200 = vmatpush3.bf16.msra.mxu0 %v197_v3 }
  0x2b   :  { %202 = vmatprep.subr.bf16.mxu0 %v201_v6  ;;  %p261_p5 = por %p260_p4, %p259_p3 }
  0x2d   :  { %p262_p6 = pnand %p261_p5, %p255_p2 }
  0x2e   :  { %204 = vmatpush3.bf16.msra.mxu0 %v201_v6 }
  0x31   :  { %195 = vmatmul.mubr.msk.f32.vlgmr.msra.gmra.mrb[0].mxu0 %vm49_vm0, %v44_v7 }
 0x104   :  { %v196_v8 = vpop.f32.mrb[0].mxu0 }
 0x105   :  { %v137_v9 = vrot.slane %v196_v8, 4  ;;  %v122_v10 = vpop.f32.mrb[1].mxu0 }
 0x106   :  { %v131_v11 = vrot.slane %v122_v10, 4 }
 0x107   :  { %v138_v12 = vmax.f32 %v196_v8, %v137_v9 }
 0x108   :  { %v132_v13 = vmax.f32 %v122_v10, %v131_v11 }
 0x109   :  { %v139_v14 = vrot.slane %v138_v12, 2 }
 0x10a   :  { %v133_v15 = vrot.slane %v132_v13, 2 }
 0x10b   :  { %v140_v16 = vmax.f32 %v138_v12, %v139_v14 }
 0x10c   :  { %v134_v17 = vmax.f32 %v132_v13, %v133_v15 }
 0x10d   :  { %v141_v18 = vrot.slane %v140_v16, 1 }
 0x10e   :  { %v135_v19 = vrot.slane %v134_v17, 1 }
 0x10f   :  { %v142_v21 = vmax.f32 %v140_v16, %v141_v18 }
 0x110   :  { %v136_v22 = vmax.f32 %v134_v17, %v135_v19 }
 0x111   :  { %v151_v23 = vadd.f32 %v179_v20, %v142_v21 }
 0x112   :  { %v150_v24 = vadd.f32 %v179_v20, %v136_v22 }
 0x113   :  { %v153_v25 = vmax.f32 %v151_v23, 0.0 }
 0x114   :  { %v152_v26 = vmax.f32 %v150_v24, 0.0 }
 0x115   :  { %v156_v27 = vrot.slane %v153_v25, 7 }
 0x117   :  { %v158_v28 = vsel %vm157_vm1, %v156_v27, %v152_v26 }
 0x118   :  { %160 = vst [vmem:[#allocation7] sm:$0x3] %v158_v28 }
 0x119   :  { %265 = shalt.err (!%p262_p6)
}
 0x11a   :  { %s266_s15 = scalar_lea.hbm %s349_s3, 32 }
 0x11b   :  { %p267_p7 = scmp.ne.s32.totalorder %s349_s3, %s266_s15  ;;  %p270_p8 = scmp.lt.u32.totalorder %s266_s15, %s349_s3 }
 0x11d   :  { %p272_p9 = pnand %p270_p8, %p267_p7 }
 0x11f   :  { %275 = shalt.err (!%p272_p9)
}
 0x120   :  { %170 = dma.vmem_to_hbm [thread:$0]  %s168_s12, 32, %s349_s3, [#allocation4]  }
 0x121   :  { %280 = dma.done.wait [#allocation4], 32  }
 0x122   :  { %281 = vsyncadd [#allocation4], 4294967264 }
 0x123   :  { %174 = vsyncpa [#allocation3], 1 }
 0x124   :  { %175 = vsyncpa [#allocation6], 1 }
 0x125   :  { %176 = vsyncpa [#allocation4], 1 }

</bundles_post_ra>
